<compile_context>
chip_gen: v5e
topology: v5e:2x2
jax: 0.10.0
libtpu: 0.0.40
codegen_flags: <defaults>
</compile_context>

<pallas_src>
import jax
import jax.numpy as jnp
from jax.experimental import pallas as pl
from jax.experimental.pallas import tpu as pltpu


def _up_kernel(x_ref, w_ref, b_ref, a_ref, o_ref):
    """o = PReLU(W @ x + b) on one (C, T) lane-dense spatial tile."""
    y = jnp.dot(w_ref[...], x_ref[...], preferred_element_type=jnp.float32)
    y = y + b_ref[...]                       # (C, 1) broadcast across lanes
    alpha = a_ref[0]                         # scalar PReLU slope from SMEM
    o_ref[...] = jnp.where(y > 0.0, y, alpha * y).astype(o_ref.dtype)


def _vmem_capacity_bytes() -> int:
    try:
        return int(pltpu.get_tpu_info().vmem_capacity_bytes)
    except Exception:
        # Older jax / CPU tracing: assume the smallest generation (v7x, 64 MiB).
        return 64 << 20


def _choose_tile_hw(hw: int, c: int, esize: int, act_budget: int) -> int:
    """Largest lane-friendly spatial tile whose pipelined blocks fit the budget."""
    per_lane = 4 * c * esize            # 2 (in + out) x 2 (double buffer) blocks
    max_tile = max(128, act_budget // per_lane)
    if hw <= max_tile:
        return hw
    cap = (max_tile // 128) * 128
    for t in range(cap, 127, -128):     # prefer an exact divisor: no masked edge
        if hw % t == 0:
            return t
    return cap                          # non-dividing tile; edge block is padded


def up_forward(x, weight, bias, alpha, *, tile_hw=None):
    """Equivalent of _up.forward: PixelShuffle(2)(PReLU(Conv1x1(x)))

    x:      [N, C, H, W]   (NCHW)
    weight: [C, C, 1, 1]   (out, in, 1, 1)
    bias:   [C]
    alpha:  scalar (nn.PReLU() default: single parameter)
    returns [N, C//4, 2H, 2W]
    """
    N, C, H, W = x.shape
    assert C % 4 == 0, "PixelShuffle(2) requires C % 4 == 0"
    HW = H * W
    esize = jnp.dtype(x.dtype).itemsize

    vmem_cap = _vmem_capacity_bytes()
    # ~40% of VMEM for the 4 pipelined activation blocks, after reserving room
    # for the (double-buffered) weight + bias.
    param_bytes = 2 * (C * C * esize + C * 4) + (8 << 10)
    act_budget = max(int(vmem_cap * 0.4) - param_bytes, 4 << 20)

    if tile_hw is None:
        tile_hw = _choose_tile_hw(HW, C, esize, act_budget)
        # Megacore balance (v7x has 2 TensorCores): keep >= 2 parallel steps.
        if N == 1 and tile_hw >= HW and HW >= 256:
            half = (((HW + 1) // 2) + 127) // 128 * 128
            tile_hw = min(half, HW)
    num_t = pl.cdiv(HW, tile_hw)

    x3 = x.reshape(N, C, HW)                          # contiguous view, no copy
    w = weight.reshape(C, C).astype(x.dtype)          # native MXU dtype
    b = bias.reshape(C, 1).astype(jnp.float32)
    a = jnp.asarray(alpha, jnp.float32).reshape(1)

    # VMEM limit from the real double-buffered requirement (with headroom),
    # never clamped below it, capped at physical capacity.
    required = 4 * C * tile_hw * esize + param_bytes
    vmem_limit = int(min(vmem_cap, max(2 * required, 32 << 20)))

    y3 = pl.pallas_call(
        _up_kernel,
        out_shape=jax.ShapeDtypeStruct((N, C, HW), x.dtype),
        grid_spec=pltpu.PrefetchScalarGridSpec(
            num_scalar_prefetch=0,
            grid=(N, num_t),
            in_specs=[
                pl.BlockSpec((None, C, tile_hw), lambda n, t: (n, 0, t)),  # x
                pl.BlockSpec((C, C), lambda n, t: (0, 0)),                 # W
                pl.BlockSpec((C, 1), lambda n, t: (0, 0)),                 # bias
                pl.BlockSpec(memory_space=pltpu.MemorySpace.SMEM),         # alpha
            ],
            out_specs=pl.BlockSpec((None, C, tile_hw), lambda n, t: (n, 0, t)),
        ),
        compiler_params=pltpu.CompilerParams(
            dimension_semantics=("parallel", "parallel"),
            vmem_limit_bytes=vmem_limit,
        ),
    )(x3, w, b, a)

    # PixelShuffle(2): [N, C, H, W] -> [N, C//4, 2H, 2W]
    # TODO(synk): fuse this into the kernel writeback (saves one HBM round
    # trip). It needs a stride-2 lane interleave (zip) of channel pairs along
    # the 128-lane axis, which is not robustly expressible with BlockSpec
    # windows / Mosaic minor-dim reshapes or strided lane stores today.
    r = 2
    co = C // (r * r)
    y = y3.reshape(N, co, r, r, H, W)
    y = jnp.transpose(y, (0, 1, 4, 2, 5, 3)).reshape(N, co, H * r, W * r)
    return y


def _reference(x, weight, bias, alpha):
    N, C, H, W = x.shape
    w = weight.reshape(C, C)
    y = jnp.einsum("oc,nchw->nohw", w, x) + bias.reshape(1, C, 1, 1)
    y = jnp.where(y > 0, y, alpha * y)
    r = 2
    co = C // (r * r)
    y = y.reshape(N, co, r, r, H, W)
    y = jnp.transpose(y, (0, 1, 4, 2, 5, 3)).reshape(N, co, H * r, W * r)
    return y


if __name__ == "__main__":
    key = jax.random.PRNGKey(0)
    kx, kw, kb = jax.random.split(key, 3)

    N, C, H, W = 2, 8, 16, 16                # channel_in = 8 (must be % 4 == 0)
    x = jax.random.normal(kx, (N, C, H, W), dtype=jnp.float32)

    # Deterministic parameters (PyTorch-shape-equivalent):
    #   conv.weight: [C, C, 1, 1], conv.bias: [C], PReLU alpha = 0.25 (default)
    fan_in = C
    bound = 1.0 / (fan_in ** 0.5)
    weight = jax.random.uniform(kw, (C, C, 1, 1), jnp.float32, -bound, bound)
    bias = jax.random.uniform(kb, (C,), jnp.float32, -bound, bound)
    alpha = 0.25

    up_fn = jax.jit(up_forward)
    out = up_fn(x, weight, bias, alpha)
    out = jax.block_until_ready(out)

    ref = _reference(x, weight, bias, alpha)
    assert out.shape == (N, C // 4, 2 * H, 2 * W), out.shape
    assert jnp.allclose(out, ref, atol=1e-5, rtol=1e-5), "mismatch vs reference"

    print("KERNEL_OK")
</pallas_src>

<mosaic_0001>
module attributes {stable_mosaic.version = 11 : i64} {
  func.func @_up_kernel(%arg0: i32, %arg1: i32, %arg2: memref<1x8x256xf32, #tpu.memory_space<vmem>>, %arg3: memref<8x8xf32, #tpu.memory_space<vmem>>, %arg4: memref<8x1xf32, #tpu.memory_space<vmem>>, %arg5: memref<1xf32, #tpu.memory_space<smem>>, %arg6: memref<1x8x256xf32, #tpu.memory_space<vmem>>) attributes {dimension_semantics = [#tpu.dimension_semantics<parallel>, #tpu.dimension_semantics<parallel>], iteration_bounds = array<i64: 2, 1>, scalar_prefetch = 0 : i64, scratch_operands = 0 : i64, tpu.core_type = #tpu.core_type<tc>, window_params = [{transform_indices = @transform_0, window_bounds = array<i64: 1, 8, 256>}, {pipeline_mode = #tpu.pipeline_mode<synchronous>, transform_indices = @transform_1, window_bounds = array<i64: 8, 8>}, {pipeline_mode = #tpu.pipeline_mode<synchronous>, transform_indices = @transform_2, window_bounds = array<i64: 8, 1>}, {transform_indices = @transform_3, window_bounds = array<i64: 1>}, {transform_indices = @transform_4, window_bounds = array<i64: 1, 8, 256>}]} {
    %c0 = arith.constant 0 : index
    %c0_0 = arith.constant 0 : index
    %0 = vector.load %arg3[%c0, %c0_0] : memref<8x8xf32, #tpu.memory_space<vmem>>, vector<8x8xf32>
    %c0_1 = arith.constant 0 : index
    %c0_2 = arith.constant 0 : index
    %c0_3 = arith.constant 0 : index
    %1 = vector.load %arg2[%c0_1, %c0_2, %c0_3] : memref<1x8x256xf32, #tpu.memory_space<vmem>>, vector<1x8x256xf32>
    %2 = vector.shape_cast %1 : vector<1x8x256xf32> to vector<8x256xf32>
    %cst = arith.constant dense<0.000000e+00> : vector<8x256xf32>
    %3 = tpu.matmul %0, %2, %cst {dimension_numbers = #tpu.dot_dimension_numbers<[1], [0], [0], [1], [0, 0, 1, 1], [], []>} : vector<8x8xf32>, vector<8x256xf32>, vector<8x256xf32> -> vector<8x256xf32>
    %c0_4 = arith.constant 0 : index
    %c0_5 = arith.constant 0 : index
    %4 = vector.load %arg4[%c0_4, %c0_5] : memref<8x1xf32, #tpu.memory_space<vmem>>, vector<8x1xf32>
    %5 = vector.broadcast %4 : vector<8x1xf32> to vector<8x256xf32>
    %6 = arith.addf %3, %5 : vector<8x256xf32>
    %c0_6 = arith.constant 0 : index
    %7 = memref.load %arg5[%c0_6] : memref<1xf32, #tpu.memory_space<smem>>
    %cst_7 = arith.constant 0.000000e+00 : f32
    %8 = vector.broadcast %cst_7 : f32 to vector<8x256xf32>
    %9 = arith.cmpf ogt, %6, %8 : vector<8x256xf32>
    %10 = vector.broadcast %7 : f32 to vector<8x256xf32>
    %11 = arith.mulf %10, %6 : vector<8x256xf32>
    %12 = arith.select %9, %6, %11 : vector<8x256xi1>, vector<8x256xf32>
    %c0_8 = arith.constant 0 : index
    %c0_9 = arith.constant 0 : index
    %c0_10 = arith.constant 0 : index
    %13 = vector.load %arg6[%c0_8, %c0_9, %c0_10] : memref<1x8x256xf32, #tpu.memory_space<vmem>>, vector<1x8x256xf32>
    %14 = vector.shape_cast %13 : vector<1x8x256xf32> to vector<8x256xf32>
    %15 = vector.shape_cast %12 : vector<8x256xf32> to vector<1x8x256xf32>
    tpu.vector_store %arg6[%c0_8, %c0_9, %c0_10], %15 {strides = array<i32>} : memref<1x8x256xf32, #tpu.memory_space<vmem>>, vector<1x8x256xf32>,
    return
  }
  func.func @transform_0(%arg0: i32, %arg1: i32) -> (i32, i32, i32) {
    %c0_i32 = arith.constant 0 : i32
    %c0_i32_0 = arith.constant 0 : i32
    return %arg0, %c0_i32, %arg1 : i32, i32, i32
  }
  func.func @transform_1(%arg0: i32, %arg1: i32) -> (i32, i32) {
    %c0_i32 = arith.constant 0 : i32
    %c0_i32_0 = arith.constant 0 : i32
    %c0_i32_1 = arith.constant 0 : i32
    return %c0_i32, %c0_i32_0 : i32, i32
  }
  func.func @transform_2(%arg0: i32, %arg1: i32) -> (i32, i32) {
    %c0_i32 = arith.constant 0 : i32
    %c0_i32_0 = arith.constant 0 : i32
    %c0_i32_1 = arith.constant 0 : i32
    return %c0_i32, %c0_i32_0 : i32, i32
  }
  func.func @transform_3(%arg0: i32, %arg1: i32) -> i32 {
    %c0_i32 = arith.constant 0 : i32
    %c0_i32_0 = arith.constant 0 : i32
    return %c0_i32 : i32
  }
  func.func @transform_4(%arg0: i32, %arg1: i32) -> (i32, i32, i32) {
    %c0_i32 = arith.constant 0 : i32
    %c0_i32_0 = arith.constant 0 : i32
    return %arg0, %c0_i32, %arg1 : i32, i32, i32
  }
}

</mosaic_0001>

<bundles_post_ra>
// kernel: up_forward.1
= control target key start
LH: loop header
LB: loop body
LE: loop exit
PB: predicated region body
PF: predicated region fallthrough
CT: control target
= control target key end

     0   :  { %s482_s17 = smov 0   ;;  %s484_s18 = smov 0   ;;  %s521_s0 = inlined_call_operand.vmem [shape: f32[2,8,256], index: 0, kind: input, shape index: {}]   ;;  %s522_s1 = inlined_call_operand.vmem [shape: f32[8,8], index: 1, kind: input, shape index: {}]   ;;  %s523_s2 = inlined_call_operand.vmem [shape: f32[8,1], index: 2, kind: input, shape index: {}]   ;;  %s524_s3 = inlined_call_operand.<no memory space> [shape: f32[1], index: 3, kind: input, shape index: {}]   ;;  %s525_s4 = inlined_call_operand.vmem [shape: f32[2,8,256], index: 4, kind: output, shape index: {}]  }
   0x1   :  { %9 = sst [smem:[#allocation2]] %s524_s3  ;;  %s486_s19 = smov 0  }
   0x2 LB: > { %s27_s3 = sadd.s32 1, %s447_s18  ;;  %p392_p0 = scmp.ge.s32.totalorder %s451_s19, 1  ;;  %s451_s19 = sphi %s486_s19, %s15_s19   ;;  %s447_s18 = sphi %s484_s18, %s527_s18   ;;  %s443_s17 = sphi %s482_s17, %s526_s17  }
   0x3   : > { %p29_p1 = scmp.ge.s32.totalorder %s27_s3, 2  ;;  %p184_p2 = scmp.lt.s32.totalorder %s451_s19, 3 }
   0x5   : > { %s529_s3 = smov (%p29_p1, %s27_s3), 0  ;;  %p185_p3 = pnand %p392_p0, %p184_p2 }
   0x6   : > { %p219_p4 = scmp.lt.s32.totalorder (!%p185_p3), %s443_s17, 1  ;;  %s291_s28 = sld [smem:[#allocation2]] (!%p185_p3) }
   0x7   : > { %188 = sbr.rel (%p185_p3) target bundleno = 150 (0x96), region = 36 }
   0xc   : > { %v241_v0 = vld [vmem:[%s523_s2] sm:$0xff]  ;;  %v453_v1 = vmov 0   ;;  %s531_s17 = smov (!%p219_p4, %s443_s17), 1  ;;  %vm247_vm0 = vcmask 64512   ;;  %v294_v7 = vstv %s291_s28 }
   0xd   : > { %428 = vset.pattern.permute.xlu0 %v453_v1  ;;  %s401_s22 = sshll.u32 %s531_s17, 4  ;;  %v238_v2 = vld [vmem:[%s522_s1] sm:$0xff] }
   0xe   : > { %244 = vperm.xlu0 %428, %v241_v0   ;;  %s226_s25 = scalar_lea.vmem %s521_s0, %s401_s22  ;;  %s236_s5 = scalar_lea.vmem %s525_s4, %s401_s22 }
   0xf   : > { %v239_v3 = vld [vmem:[%s226_s25] sm:$0xff]  ;;  %v240_v4 = vld [vmem:[%s226_s25 + $0x8] sm:$0xff] }
  0x10   : > { %266 = vmatpush.msra.mxu0 %v239_v3  ;;  %286 = vmatpush.msra.mxu1 %v240_v4 }
  0x11   : > { %397 = vmatmul.msk.f32.vlgmr.msra.gmra.mxu0 %vm247_vm0, %v238_v2  ;;  %398 = vmatmul.msk.f32.vlgmr.msra.gmra.mxu1 %vm247_vm0, %v238_v2 }
  0x80   : > { %v245_v5 = vpop.permute.xlu0 %244 }
  0x8e   : > { %v268_v6 = vpop.f32.mrf.mxu0  ;;  %v288_v8 = vpop.f32.mrf.mxu1 }
  0x8f   : > { %v269_v9 = vadd.f32 %v268_v6, %v245_v5  ;;  %v289_v10 = vadd.f32 %v288_v8, %v245_v5 }
  0x91   : > { %vm292_vm1 = vcmp.gt.f32.partialorder %v269_v9, 0.0  ;;  %v295_v11 = vmul.f32 %v294_v7, %v269_v9  ;;  %vm293_vm2 = vcmp.gt.f32.partialorder %v289_v10, 0.0  ;;  %v296_v12 = vmul.f32 %v294_v7, %v289_v10 }
  0x93   : > { %v297_v13 = vsel %vm292_vm1, %v269_v9, %v295_v11  ;;  %v298_v14 = vsel %vm293_vm2, %v289_v10, %v296_v12 }
  0x94   : > { %299 = vst [vmem:[%s236_s5] sm:$0xff] %v297_v13 }
  0x95   : > { %300 = vst [vmem:[%s236_s5 + $0x8] sm:$0xff] %v298_v14 }
  0x96 PF: > { %s15_s19 = sadd.s32 1, %s451_s19   ;;  %s526_s17 = smov %s447_s18 }
  0x97   : > { %p12_p5 = scmp.ge.s32.totalorder %s15_s19, 4   ;;  %s527_s18 = smov %s529_s3 }
  0x99   :  { %14 = sbr.rel (!%p12_p5) target bundleno = 2 (0x2), region = 66 }

</bundles_post_ra>
